<compile_context>
chip_gen: v6e
topology: v6e:2x2x1
jax: 0.10.0
libtpu: 0.0.40
codegen_flags: <defaults>
</compile_context>

<pallas_src>
import numpy as np

import jax
import jax.numpy as jnp
from jax.experimental import pallas as pl
from jax.experimental.pallas import tpu as pltpu

BN_EPS = 1e-5


# ---------------------------------------------------------------------------
# Fused kernel
# ---------------------------------------------------------------------------
def _bn_cols(v, g, b):
    """Training-mode BatchNorm along axis=1 of a (C, S) tile (biased var)."""
    mu = jnp.mean(v, axis=1, keepdims=True)
    var = jnp.mean((v - mu) ** 2, axis=1, keepdims=True)
    return (v - mu) * jax.lax.rsqrt(var + BN_EPS) * g + b


def _make_mbconv_kernel(n, cin, cmid, cout, h, w, stride, use_sc_conv):
    hw = h * w
    nhw = n * hw
    taps = [(dy, dx) for dy in (-1, 0, 1) for dx in (-1, 0, 1)]  # t = (dy+1)*3+(dx+1)

    def kernel(*args):
        (x_ref, wexp_ref, w2_ref, w3t_ref, mask_ref,
         g1_ref, b1_ref, g2_ref, b2_ref, g3_ref, b3_ref) = args[:11]
        rest = list(args[11:])
        o_ref = rest.pop()                       # output ref is last
        gsc_ref = bsc_ref = sel_ref = None
        if use_sc_conv:
            gsc_ref = rest.pop(0)
            bsc_ref = rest.pop(0)
        if stride > 1:
            sel_ref = rest.pop(0)

        # ---- gather the batch into one lane-dense (Cin, N*H*W) slab --------
        xv = x_ref[...]                                        # (N, Cin, HW)
        xcat = jnp.concatenate([xv[i] for i in range(n)], axis=1)  # (Cin, NHW)

        # ---- expand 1x1 (+ fused shortcut 1x1): single MXU matmul ----------
        comb = jnp.dot(wexp_ref[...], xcat,
                       preferred_element_type=jnp.float32)     # (Cmid[+Cout], NHW)
        h1 = jnp.maximum(_bn_cols(comb[:cmid], g1_ref[...], b1_ref[...]), 0.0)

        # ---- depthwise 3x3, pad=1: XLU rolls + precomputed edge masks ------
        w2 = w2_ref[...]                                       # (Cmid, 9)
        m = mask_ref[...]                                      # (9, NHW)
        dw = h1 * m[4:5, :] * w2[:, 4:5]                       # center tap (0,0)
        for t, (dy, dx) in enumerate(taps):
            if (dy, dx) == (0, 0):
                continue
            k = dy * w + dx                                    # flattened shift
            shifted = pltpu.roll(h1, shift=(-k) % nhw, axis=1)
            dw = dw + shifted * m[t:t + 1, :] * w2[:, t:t + 1]

        # ---- stride > 1: compact to the strided grid with a selection matmul
        if stride > 1:
            dw = jnp.dot(dw, sel_ref[...], preferred_element_type=jnp.float32)

        h2 = jnp.maximum(_bn_cols(dw, g2_ref[...], b2_ref[...]), 0.0)

        # ---- project 1x1 + BN3 (+ residual when stride == 1) ---------------
        out = _bn_cols(jnp.dot(w3t_ref[...], h2,
                               preferred_element_type=jnp.float32),
                       g3_ref[...], b3_ref[...])               # (Cout, S)
        if stride == 1:
            if use_sc_conv:
                out = out + _bn_cols(comb[cmid:], gsc_ref[...], bsc_ref[...])
            else:
                out = out + xcat                               # identity shortcut

        # ---- scatter back to per-batch NC(HW) layout ------------------------
        sb = out.shape[1] // n
        for i in range(n):
            o_ref[i] = out[:, i * sb:(i + 1) * sb]

    return kernel


# ---------------------------------------------------------------------------
# pallas_call wrapper (single fused call, grid=(1,), full-array blocks)
# ---------------------------------------------------------------------------
def _full_spec(shape):
    nd = len(shape)
    return pl.BlockSpec(shape, lambda i, nd=nd: (0,) * nd)


def mbconv_forward(x_nchw, params, stride):
    (w1, w2, w3, wsc, g1, b1, g2, b2, g3, b3, gsc, bsc) = params
    x_nchw = x_nchw.astype(jnp.float32)
    n, cin, h, w = x_nchw.shape
    cmid, cout = w1.shape[1], w3.shape[1]
    ho = (h + 2 - 3) // stride + 1
    wo = (w + 2 - 3) // stride + 1
    hw, nhw = h * w, n * h * w
    use_sc_conv = (stride == 1 and cin != cout)

    # free reshape only: NCHW -> (N, Cin, H*W); no transpose / pad on the data path
    x3 = x_nchw.reshape(n, cin, hw)

    # tiny one-time weight repacks into kernel-friendly layouts
    if use_sc_conv:
        wexp = jnp.concatenate([w1.T, wsc.T], axis=0)          # (Cmid+Cout, Cin)
    else:
        wexp = w1.T                                            # (Cmid, Cin)
    w3t = w3.T                                                 # (Cout, Cmid)
    col = lambda v: v.reshape(-1, 1)                           # (C,) -> (C, 1)

    # compile-time constants: depthwise edge masks (replace the halo padding)
    s = np.arange(nhw)
    yy = (s // w) % h
    xx = s % w
    masks = np.stack(
        [((yy + dy >= 0) & (yy + dy < h) & (xx + dx >= 0) & (xx + dx < w))
         for dy in (-1, 0, 1) for dx in (-1, 0, 1)]).astype(np.float32)  # (9, NHW)

    inputs = [x3, wexp, w2, w3t, jnp.asarray(masks),
              col(g1), col(b1), col(g2), col(b2), col(g3), col(b3)]
    if use_sc_conv:
        inputs += [col(gsc), col(bsc)]
    if stride > 1:
        # selection matrix: picks the strided output positions (in-kernel subsample)
        j = np.arange(n * ho * wo)
        nj, rj = j // (ho * wo), j % (ho * wo)
        sj = nj * hw + (rj // wo) * stride * w + (rj % wo) * stride
        sel = np.zeros((nhw, n * ho * wo), np.float32)
        sel[sj, j] = 1.0
        inputs.append(jnp.asarray(sel))

    kernel = _make_mbconv_kernel(n, cin, cmid, cout, h, w, stride, use_sc_conv)
    out = pl.pallas_call(
        kernel,
        grid=(1,),
        in_specs=[_full_spec(a.shape) for a in inputs],
        out_specs=_full_spec((n, cout, ho * wo)),
        out_shape=jax.ShapeDtypeStruct((n, cout, ho * wo), jnp.float32),
        compiler_params=pltpu.CompilerParams(
            dimension_semantics=("arbitrary",)),
    )(*inputs)
    return out.reshape(n, cout, ho, wo)                        # free reshape to NCHW


# ---------------------------------------------------------------------------
# Pure-JAX reference (standard NCHW math, no Pallas) for correctness checks
# ---------------------------------------------------------------------------
def reference_forward(x, params, stride):
    (w1, w2, w3, wsc, g1, b1, g2, b2, g3, b3, gsc, bsc) = params
    x = x.astype(jnp.float32)
    n, cin, h, w = x.shape
    cout = w3.shape[1]
    ho = (h + 2 - 3) // stride + 1
    wo = (w + 2 - 3) // stride + 1

    def bn(v, g, b):
        mu = v.mean(axis=(0, 2, 3), keepdims=True)
        var = ((v - mu) ** 2).mean(axis=(0, 2, 3), keepdims=True)
        return ((v - mu) * jax.lax.rsqrt(var + BN_EPS) * g.reshape(1, -1, 1, 1)
                + b.reshape(1, -1, 1, 1))

    h1 = jax.nn.relu(bn(jnp.einsum('nchw,cd->ndhw', x, w1), g1, b1))
    hp = jnp.pad(h1, ((0, 0), (0, 0), (1, 1), (1, 1)))
    dw = sum(hp[:, :, kh:kh + stride * (ho - 1) + 1:stride,
                kw:kw + stride * (wo - 1) + 1:stride]
             * w2[:, kh * 3 + kw].reshape(1, -1, 1, 1)
             for kh in range(3) for kw in range(3))
    h2 = jax.nn.relu(bn(dw, g2, b2))
    out = bn(jnp.einsum('nchw,cd->ndhw', h2, w3), g3, b3)
    if stride == 1:
        sc = x if cin == cout else bn(jnp.einsum('nchw,cd->ndhw', x, wsc), gsc, bsc)
        out = out + sc
    return out


# ---------------------------------------------------------------------------
# Deterministic parameters (matches MBConvBlock.__init__ shapes; PyTorch
# (Cout,Cin,1,1) 1x1 weights stored transposed as (Cin,Cout); depthwise
# (C,1,3,3) stored as (C, 9) with index kh*3+kw)
# ---------------------------------------------------------------------------
def make_params(key, cin, cout, expansion):
    cmid = expansion * cin
    ks = jax.random.split(key, 12)
    w1 = 0.1 * jax.random.normal(ks[0], (cin, cmid), jnp.float32)
    w2 = 0.1 * jax.random.normal(ks[1], (cmid, 9), jnp.float32)
    w3 = 0.1 * jax.random.normal(ks[2], (cmid, cout), jnp.float32)
    wsc = 0.1 * jax.random.normal(ks[3], (cin, cout), jnp.float32)
    g1 = 1.0 + 0.1 * jax.random.normal(ks[4], (cmid,), jnp.float32)
    b1 = 0.1 * jax.random.normal(ks[5], (cmid,), jnp.float32)
    g2 = 1.0 + 0.1 * jax.random.normal(ks[6], (cmid,), jnp.float32)
    b2 = 0.1 * jax.random.normal(ks[7], (cmid,), jnp.float32)
    g3 = 1.0 + 0.1 * jax.random.normal(ks[8], (cout,), jnp.float32)
    b3 = 0.1 * jax.random.normal(ks[9], (cout,), jnp.float32)
    gsc = 1.0 + 0.1 * jax.random.normal(ks[10], (cout,), jnp.float32)
    bsc = 0.1 * jax.random.normal(ks[11], (cout,), jnp.float32)
    return (w1, w2, w3, wsc, g1, b1, g2, b2, g3, b3, gsc, bsc)


if __name__ == "__main__":
    key = jax.random.PRNGKey(0)
    kx, kp = jax.random.split(key)

    configs = [
        # (N, Cin, H, W, Cout, expansion, stride)
        (2, 4, 16, 16, 8, 2, 1),   # conv shortcut (cin != cout)
        (2, 8, 16, 16, 8, 2, 1),   # identity shortcut (cin == cout)
        (2, 4, 16, 16, 8, 2, 2),   # stride 2, no shortcut
    ]
    for (n, cin, hh, ww, cout, exp, stride) in configs:
        kx, kxi = jax.random.split(kx)
        kp, kpi = jax.random.split(kp)
        x = jax.random.normal(kxi, (n, cin, hh, ww), jnp.float32)   # PyTorch NCHW
        params = make_params(kpi, cin, cout, exp)

        out = jax.block_until_ready(mbconv_forward(x, params, stride))
        ref = reference_forward(x, params, stride)

        ho = (hh + 2 - 3) // stride + 1
        wo = (ww + 2 - 3) // stride + 1
        assert out.shape == (n, cout, ho, wo), out.shape
        err = float(jnp.max(jnp.abs(out - ref)))
        assert err < 1e-3, f"stride={stride} cin={cin} max_err={err}"

    print("KERNEL_OK")
</pallas_src>

<mosaic_0001>
module attributes {stable_mosaic.version = 11 : i64} {
  func.func @kernel(%arg0: i32, %arg1: memref<2x4x256xf32, #tpu.memory_space<vmem>>, %arg2: memref<16x4xf32, #tpu.memory_space<vmem>>, %arg3: memref<8x9xf32, #tpu.memory_space<vmem>>, %arg4: memref<8x8xf32, #tpu.memory_space<vmem>>, %arg5: memref<9x512xf32, #tpu.memory_space<vmem>>, %arg6: memref<8x1xf32, #tpu.memory_space<vmem>>, %arg7: memref<8x1xf32, #tpu.memory_space<vmem>>, %arg8: memref<8x1xf32, #tpu.memory_space<vmem>>, %arg9: memref<8x1xf32, #tpu.memory_space<vmem>>, %arg10: memref<8x1xf32, #tpu.memory_space<vmem>>, %arg11: memref<8x1xf32, #tpu.memory_space<vmem>>, %arg12: memref<8x1xf32, #tpu.memory_space<vmem>>, %arg13: memref<8x1xf32, #tpu.memory_space<vmem>>, %arg14: memref<2x8x256xf32, #tpu.memory_space<vmem>>) attributes {dimension_semantics = [#tpu.dimension_semantics<arbitrary>], iteration_bounds = array<i64: 1>, scalar_prefetch = 0 : i64, scratch_operands = 0 : i64, tpu.core_type = #tpu.core_type<tc>, window_params = [{pipeline_mode = #tpu.pipeline_mode<synchronous>, transform_indices = @transform_0, window_bounds = array<i64: 2, 4, 256>}, {pipeline_mode = #tpu.pipeline_mode<synchronous>, transform_indices = @transform_1, window_bounds = array<i64: 16, 4>}, {pipeline_mode = #tpu.pipeline_mode<synchronous>, transform_indices = @transform_2, window_bounds = array<i64: 8, 9>}, {pipeline_mode = #tpu.pipeline_mode<synchronous>, transform_indices = @transform_3, window_bounds = array<i64: 8, 8>}, {pipeline_mode = #tpu.pipeline_mode<synchronous>, transform_indices = @transform_4, window_bounds = array<i64: 9, 512>}, {pipeline_mode = #tpu.pipeline_mode<synchronous>, transform_indices = @transform_5, window_bounds = array<i64: 8, 1>}, {pipeline_mode = #tpu.pipeline_mode<synchronous>, transform_indices = @transform_6, window_bounds = array<i64: 8, 1>}, {pipeline_mode = #tpu.pipeline_mode<synchronous>, transform_indices = @transform_7, window_bounds = array<i64: 8, 1>}, {pipeline_mode = #tpu.pipeline_mode<synchronous>, transform_indices = @transform_8, window_bounds = array<i64: 8, 1>}, {pipeline_mode = #tpu.pipeline_mode<synchronous>, transform_indices = @transform_9, window_bounds = array<i64: 8, 1>}, {pipeline_mode = #tpu.pipeline_mode<synchronous>, transform_indices = @transform_10, window_bounds = array<i64: 8, 1>}, {pipeline_mode = #tpu.pipeline_mode<synchronous>, transform_indices = @transform_11, window_bounds = array<i64: 8, 1>}, {pipeline_mode = #tpu.pipeline_mode<synchronous>, transform_indices = @transform_12, window_bounds = array<i64: 8, 1>}, {pipeline_mode = #tpu.pipeline_mode<synchronous>, transform_indices = @transform_13, window_bounds = array<i64: 2, 8, 256>}]} {
    %c0 = arith.constant 0 : index
    %c0_0 = arith.constant 0 : index
    %c0_1 = arith.constant 0 : index
    %0 = vector.load %arg1[%c0, %c0_0, %c0_1] : memref<2x4x256xf32, #tpu.memory_space<vmem>>, vector<2x4x256xf32>
    %1 = vector.extract_strided_slice %0 {offsets = [0, 0, 0], sizes = [1, 4, 256], strides = [1, 1, 1]} : vector<2x4x256xf32> to vector<1x4x256xf32>
    %2 = vector.shape_cast %1 : vector<1x4x256xf32> to vector<4x256xf32>
    %3 = vector.extract_strided_slice %0 {offsets = [1, 0, 0], sizes = [1, 4, 256], strides = [1, 1, 1]} : vector<2x4x256xf32> to vector<1x4x256xf32>
    %4 = vector.shape_cast %3 : vector<1x4x256xf32> to vector<4x256xf32>
    %5 = tpu.concatenate %2, %4 in 1 : vector<4x256xf32>, vector<4x256xf32> -> vector<4x512xf32>
    %c0_2 = arith.constant 0 : index
    %c0_3 = arith.constant 0 : index
    %6 = vector.load %arg2[%c0_2, %c0_3] : memref<16x4xf32, #tpu.memory_space<vmem>>, vector<16x4xf32>
    %cst = arith.constant dense<0.000000e+00> : vector<16x512xf32>
    %7 = tpu.matmul %6, %5, %cst {dimension_numbers = #tpu.dot_dimension_numbers<[1], [0], [0], [1], [0, 0, 1, 1], [], []>} : vector<16x4xf32>, vector<4x512xf32>, vector<16x512xf32> -> vector<16x512xf32>
    %8 = vector.extract_strided_slice %7 {offsets = [0, 0], sizes = [8, 512], strides = [1, 1]} : vector<16x512xf32> to vector<8x512xf32>
    %c0_4 = arith.constant 0 : index
    %c0_5 = arith.constant 0 : index
    %9 = vector.load %arg6[%c0_4, %c0_5] : memref<8x1xf32, #tpu.memory_space<vmem>>, vector<8x1xf32>
    %c0_6 = arith.constant 0 : index
    %c0_7 = arith.constant 0 : index
    %10 = vector.load %arg7[%c0_6, %c0_7] : memref<8x1xf32, #tpu.memory_space<vmem>>, vector<8x1xf32>
    %cst_8 = arith.constant dense<0.000000e+00> : vector<8xf32>
    %11 = vector.multi_reduction <add>, %8, %cst_8 [1] : vector<8x512xf32> to vector<8xf32>
    %12 = vector.shape_cast %11 : vector<8xf32> to vector<8x1xf32>
    %cst_9 = arith.constant 5.120000e+02 : f32
    %13 = vector.broadcast %cst_9 : f32 to vector<8x1xf32>
    %14 = arith.divf %12, %13 : vector<8x1xf32>
    %15 = vector.broadcast %14 : vector<8x1xf32> to vector<8x512xf32>
    %16 = arith.subf %8, %15 : vector<8x512xf32>
    %17 = arith.mulf %16, %16 : vector<8x512xf32>
    %cst_10 = arith.constant dense<0.000000e+00> : vector<8xf32>
    %18 = vector.multi_reduction <add>, %17, %cst_10 [1] : vector<8x512xf32> to vector<8xf32>
    %19 = vector.shape_cast %18 : vector<8xf32> to vector<8x1xf32>
    %cst_11 = arith.constant 5.120000e+02 : f32
    %20 = vector.broadcast %cst_11 : f32 to vector<8x1xf32>
    %21 = arith.divf %19, %20 : vector<8x1xf32>
    %22 = vector.broadcast %14 : vector<8x1xf32> to vector<8x512xf32>
    %23 = arith.subf %8, %22 : vector<8x512xf32>
    %cst_12 = arith.constant 9.99999974E-6 : f32
    %24 = vector.broadcast %cst_12 : f32 to vector<8x1xf32>
    %25 = arith.addf %21, %24 : vector<8x1xf32>
    %26 = math.rsqrt %25 : vector<8x1xf32>
    %27 = vector.broadcast %26 : vector<8x1xf32> to vector<8x512xf32>
    %28 = arith.mulf %23, %27 : vector<8x512xf32>
    %29 = vector.broadcast %9 : vector<8x1xf32> to vector<8x512xf32>
    %30 = arith.mulf %28, %29 : vector<8x512xf32>
    %31 = vector.broadcast %10 : vector<8x1xf32> to vector<8x512xf32>
    %32 = arith.addf %30, %31 : vector<8x512xf32>
    %cst_13 = arith.constant 0.000000e+00 : f32
    %33 = vector.broadcast %cst_13 : f32 to vector<8x512xf32>
    %34 = arith.maximumf %32, %33 : vector<8x512xf32>
    %c0_14 = arith.constant 0 : index
    %c0_15 = arith.constant 0 : index
    %35 = vector.load %arg3[%c0_14, %c0_15] : memref<8x9xf32, #tpu.memory_space<vmem>>, vector<8x9xf32>
    %c0_16 = arith.constant 0 : index
    %c0_17 = arith.constant 0 : index
    %36 = vector.load %arg5[%c0_16, %c0_17] : memref<9x512xf32, #tpu.memory_space<vmem>>, vector<9x512xf32>
    %37 = vector.extract_strided_slice %36 {offsets = [4, 0], sizes = [1, 512], strides = [1, 1]} : vector<9x512xf32> to vector<1x512xf32>
    %38 = vector.broadcast %37 : vector<1x512xf32> to vector<8x512xf32>
    %39 = arith.mulf %34, %38 : vector<8x512xf32>
    %40 = vector.extract_strided_slice %35 {offsets = [0, 4], sizes = [8, 1], strides = [1, 1]} : vector<8x9xf32> to vector<8x1xf32>
    %41 = vector.broadcast %40 : vector<8x1xf32> to vector<8x512xf32>
    %42 = arith.mulf %39, %41 : vector<8x512xf32>
    %c17_i32 = arith.constant 17 : i32
    %43 = tpu.dynamic_rotate %34 by %c17_i32 dim 1 : vector<8x512xf32>, i32 -> vector<8x512xf32>
    %44 = vector.extract_strided_slice %36 {offsets = [0, 0], sizes = [1, 512], strides = [1, 1]} : vector<9x512xf32> to vector<1x512xf32>
    %45 = vector.broadcast %44 : vector<1x512xf32> to vector<8x512xf32>
    %46 = arith.mulf %43, %45 : vector<8x512xf32>
    %47 = vector.extract_strided_slice %35 {offsets = [0, 0], sizes = [8, 1], strides = [1, 1]} : vector<8x9xf32> to vector<8x1xf32>
    %48 = vector.broadcast %47 : vector<8x1xf32> to vector<8x512xf32>
    %49 = arith.mulf %46, %48 : vector<8x512xf32>
    %50 = arith.addf %42, %49 : vector<8x512xf32>
    %c16_i32 = arith.constant 16 : i32
    %51 = tpu.dynamic_rotate %34 by %c16_i32 dim 1 : vector<8x512xf32>, i32 -> vector<8x512xf32>
    %52 = vector.extract_strided_slice %36 {offsets = [1, 0], sizes = [1, 512], strides = [1, 1]} : vector<9x512xf32> to vector<1x512xf32>
    %53 = vector.broadcast %52 : vector<1x512xf32> to vector<8x512xf32>
    %54 = arith.mulf %51, %53 : vector<8x512xf32>
    %55 = vector.extract_strided_slice %35 {offsets = [0, 1], sizes = [8, 1], strides = [1, 1]} : vector<8x9xf32> to vector<8x1xf32>
    %56 = vector.broadcast %55 : vector<8x1xf32> to vector<8x512xf32>
    %57 = arith.mulf %54, %56 : vector<8x512xf32>
    %58 = arith.addf %50, %57 : vector<8x512xf32>
    %c15_i32 = arith.constant 15 : i32
    %59 = tpu.dynamic_rotate %34 by %c15_i32 dim 1 : vector<8x512xf32>, i32 -> vector<8x512xf32>
    %60 = vector.extract_strided_slice %36 {offsets = [2, 0], sizes = [1, 512], strides = [1, 1]} : vector<9x512xf32> to vector<1x512xf32>
    %61 = vector.broadcast %60 : vector<1x512xf32> to vector<8x512xf32>
    %62 = arith.mulf %59, %61 : vector<8x512xf32>
    %63 = vector.extract_strided_slice %35 {offsets = [0, 2], sizes = [8, 1], strides = [1, 1]} : vector<8x9xf32> to vector<8x1xf32>
    %64 = vector.broadcast %63 : vector<8x1xf32> to vector<8x512xf32>
    %65 = arith.mulf %62, %64 : vector<8x512xf32>
    %66 = arith.addf %58, %65 : vector<8x512xf32>
    %c1_i32 = arith.constant 1 : i32
    %67 = tpu.dynamic_rotate %34 by %c1_i32 dim 1 : vector<8x512xf32>, i32 -> vector<8x512xf32>
    %68 = vector.extract_strided_slice %36 {offsets = [3, 0], sizes = [1, 512], strides = [1, 1]} : vector<9x512xf32> to vector<1x512xf32>
    %69 = vector.broadcast %68 : vector<1x512xf32> to vector<8x512xf32>
    %70 = arith.mulf %67, %69 : vector<8x512xf32>
    %71 = vector.extract_strided_slice %35 {offsets = [0, 3], sizes = [8, 1], strides = [1, 1]} : vector<8x9xf32> to vector<8x1xf32>
    %72 = vector.broadcast %71 : vector<8x1xf32> to vector<8x512xf32>
    %73 = arith.mulf %70, %72 : vector<8x512xf32>
    %74 = arith.addf %66, %73 : vector<8x512xf32>
    %c511_i32 = arith.constant 511 : i32
    %75 = tpu.dynamic_rotate %34 by %c511_i32 dim 1 : vector<8x512xf32>, i32 -> vector<8x512xf32>
    %76 = vector.extract_strided_slice %36 {offsets = [5, 0], sizes = [1, 512], strides = [1, 1]} : vector<9x512xf32> to vector<1x512xf32>
    %77 = vector.broadcast %76 : vector<1x512xf32> to vector<8x512xf32>
    %78 = arith.mulf %75, %77 : vector<8x512xf32>
    %79 = vector.extract_strided_slice %35 {offsets = [0, 5], sizes = [8, 1], strides = [1, 1]} : vector<8x9xf32> to vector<8x1xf32>
    %80 = vector.broadcast %79 : vector<8x1xf32> to vector<8x512xf32>
    %81 = arith.mulf %78, %80 : vector<8x512xf32>
    %82 = arith.addf %74, %81 : vector<8x512xf32>
    %c497_i32 = arith.constant 497 : i32
    %83 = tpu.dynamic_rotate %34 by %c497_i32 dim 1 : vector<8x512xf32>, i32 -> vector<8x512xf32>
    %84 = vector.extract_strided_slice %36 {offsets = [6, 0], sizes = [1, 512], strides = [1, 1]} : vector<9x512xf32> to vector<1x512xf32>
    %85 = vector.broadcast %84 : vector<1x512xf32> to vector<8x512xf32>
    %86 = arith.mulf %83, %85 : vector<8x512xf32>
    %87 = vector.extract_strided_slice %35 {offsets = [0, 6], sizes = [8, 1], strides = [1, 1]} : vector<8x9xf32> to vector<8x1xf32>
    %88 = vector.broadcast %87 : vector<8x1xf32> to vector<8x512xf32>
    %89 = arith.mulf %86, %88 : vector<8x512xf32>
    %90 = arith.addf %82, %89 : vector<8x512xf32>
    %c496_i32 = arith.constant 496 : i32
    %91 = tpu.dynamic_rotate %34 by %c496_i32 dim 1 : vector<8x512xf32>, i32 -> vector<8x512xf32>
    %92 = vector.extract_strided_slice %36 {offsets = [7, 0], sizes = [1, 512], strides = [1, 1]} : vector<9x512xf32> to vector<1x512xf32>
    %93 = vector.broadcast %92 : vector<1x512xf32> to vector<8x512xf32>
    %94 = arith.mulf %91, %93 : vector<8x512xf32>
    %95 = vector.extract_strided_slice %35 {offsets = [0, 7], sizes = [8, 1], strides = [1, 1]} : vector<8x9xf32> to vector<8x1xf32>
    %96 = vector.broadcast %95 : vector<8x1xf32> to vector<8x512xf32>
    %97 = arith.mulf %94, %96 : vector<8x512xf32>
    %98 = arith.addf %90, %97 : vector<8x512xf32>
    %c495_i32 = arith.constant 495 : i32
    %99 = tpu.dynamic_rotate %34 by %c495_i32 dim 1 : vector<8x512xf32>, i32 -> vector<8x512xf32>
    %100 = vector.extract_strided_slice %36 {offsets = [8, 0], sizes = [1, 512], strides = [1, 1]} : vector<9x512xf32> to vector<1x512xf32>
    %101 = vector.broadcast %100 : vector<1x512xf32> to vector<8x512xf32>
    %102 = arith.mulf %99, %101 : vector<8x512xf32>
    %103 = vector.extract_strided_slice %35 {offsets = [0, 8], sizes = [8, 1], strides = [1, 1]} : vector<8x9xf32> to vector<8x1xf32>
    %104 = vector.broadcast %103 : vector<8x1xf32> to vector<8x512xf32>
    %105 = arith.mulf %102, %104 : vector<8x512xf32>
    %106 = arith.addf %98, %105 : vector<8x512xf32>
    %c0_18 = arith.constant 0 : index
    %c0_19 = arith.constant 0 : index
    %107 = vector.load %arg8[%c0_18, %c0_19] : memref<8x1xf32, #tpu.memory_space<vmem>>, vector<8x1xf32>
    %c0_20 = arith.constant 0 : index
    %c0_21 = arith.constant 0 : index
    %108 = vector.load %arg9[%c0_20, %c0_21] : memref<8x1xf32, #tpu.memory_space<vmem>>, vector<8x1xf32>
    %cst_22 = arith.constant dense<0.000000e+00> : vector<8xf32>
    %109 = vector.multi_reduction <add>, %106, %cst_22 [1] : vector<8x512xf32> to vector<8xf32>
    %110 = vector.shape_cast %109 : vector<8xf32> to vector<8x1xf32>
    %cst_23 = arith.constant 5.120000e+02 : f32
    %111 = vector.broadcast %cst_23 : f32 to vector<8x1xf32>
    %112 = arith.divf %110, %111 : vector<8x1xf32>
    %113 = vector.broadcast %112 : vector<8x1xf32> to vector<8x512xf32>
    %114 = arith.subf %106, %113 : vector<8x512xf32>
    %115 = arith.mulf %114, %114 : vector<8x512xf32>
    %cst_24 = arith.constant dense<0.000000e+00> : vector<8xf32>
    %116 = vector.multi_reduction <add>, %115, %cst_24 [1] : vector<8x512xf32> to vector<8xf32>
    %117 = vector.shape_cast %116 : vector<8xf32> to vector<8x1xf32>
    %cst_25 = arith.constant 5.120000e+02 : f32
    %118 = vector.broadcast %cst_25 : f32 to vector<8x1xf32>
    %119 = arith.divf %117, %118 : vector<8x1xf32>
    %120 = vector.broadcast %112 : vector<8x1xf32> to vector<8x512xf32>
    %121 = arith.subf %106, %120 : vector<8x512xf32>
    %cst_26 = arith.constant 9.99999974E-6 : f32
    %122 = vector.broadcast %cst_26 : f32 to vector<8x1xf32>
    %123 = arith.addf %119, %122 : vector<8x1xf32>
    %124 = math.rsqrt %123 : vector<8x1xf32>
    %125 = vector.broadcast %124 : vector<8x1xf32> to vector<8x512xf32>
    %126 = arith.mulf %121, %125 : vector<8x512xf32>
    %127 = vector.broadcast %107 : vector<8x1xf32> to vector<8x512xf32>
    %128 = arith.mulf %126, %127 : vector<8x512xf32>
    %129 = vector.broadcast %108 : vector<8x1xf32> to vector<8x512xf32>
    %130 = arith.addf %128, %129 : vector<8x512xf32>
    %cst_27 = arith.constant 0.000000e+00 : f32
    %131 = vector.broadcast %cst_27 : f32 to vector<8x512xf32>
    %132 = arith.maximumf %130, %131 : vector<8x512xf32>
    %c0_28 = arith.constant 0 : index
    %c0_29 = arith.constant 0 : index
    %133 = vector.load %arg4[%c0_28, %c0_29] : memref<8x8xf32, #tpu.memory_space<vmem>>, vector<8x8xf32>
    %cst_30 = arith.constant dense<0.000000e+00> : vector<8x512xf32>
    %134 = tpu.matmul %133, %132, %cst_30 {dimension_numbers = #tpu.dot_dimension_numbers<[1], [0], [0], [1], [0, 0, 1, 1], [], []>} : vector<8x8xf32>, vector<8x512xf32>, vector<8x512xf32> -> vector<8x512xf32>
    %c0_31 = arith.constant 0 : index
    %c0_32 = arith.constant 0 : index
    %135 = vector.load %arg10[%c0_31, %c0_32] : memref<8x1xf32, #tpu.memory_space<vmem>>, vector<8x1xf32>
    %c0_33 = arith.constant 0 : index
    %c0_34 = arith.constant 0 : index
    %136 = vector.load %arg11[%c0_33, %c0_34] : memref<8x1xf32, #tpu.memory_space<vmem>>, vector<8x1xf32>
    %cst_35 = arith.constant dense<0.000000e+00> : vector<8xf32>
    %137 = vector.multi_reduction <add>, %134, %cst_35 [1] : vector<8x512xf32> to vector<8xf32>
    %138 = vector.shape_cast %137 : vector<8xf32> to vector<8x1xf32>
    %cst_36 = arith.constant 5.120000e+02 : f32
    %139 = vector.broadcast %cst_36 : f32 to vector<8x1xf32>
    %140 = arith.divf %138, %139 : vector<8x1xf32>
    %141 = vector.broadcast %140 : vector<8x1xf32> to vector<8x512xf32>
    %142 = arith.subf %134, %141 : vector<8x512xf32>
    %143 = arith.mulf %142, %142 : vector<8x512xf32>
    %cst_37 = arith.constant dense<0.000000e+00> : vector<8xf32>
    %144 = vector.multi_reduction <add>, %143, %cst_37 [1] : vector<8x512xf32> to vector<8xf32>
    %145 = vector.shape_cast %144 : vector<8xf32> to vector<8x1xf32>
    %cst_38 = arith.constant 5.120000e+02 : f32
    %146 = vector.broadcast %cst_38 : f32 to vector<8x1xf32>
    %147 = arith.divf %145, %146 : vector<8x1xf32>
    %148 = vector.broadcast %140 : vector<8x1xf32> to vector<8x512xf32>
    %149 = arith.subf %134, %148 : vector<8x512xf32>
    %cst_39 = arith.constant 9.99999974E-6 : f32
    %150 = vector.broadcast %cst_39 : f32 to vector<8x1xf32>
    %151 = arith.addf %147, %150 : vector<8x1xf32>
    %152 = math.rsqrt %151 : vector<8x1xf32>
    %153 = vector.broadcast %152 : vector<8x1xf32> to vector<8x512xf32>
    %154 = arith.mulf %149, %153 : vector<8x512xf32>
    %155 = vector.broadcast %135 : vector<8x1xf32> to vector<8x512xf32>
    %156 = arith.mulf %154, %155 : vector<8x512xf32>
    %157 = vector.broadcast %136 : vector<8x1xf32> to vector<8x512xf32>
    %158 = arith.addf %156, %157 : vector<8x512xf32>
    %159 = vector.extract_strided_slice %7 {offsets = [8, 0], sizes = [8, 512], strides = [1, 1]} : vector<16x512xf32> to vector<8x512xf32>
    %c0_40 = arith.constant 0 : index
    %c0_41 = arith.constant 0 : index
    %160 = vector.load %arg12[%c0_40, %c0_41] : memref<8x1xf32, #tpu.memory_space<vmem>>, vector<8x1xf32>
    %c0_42 = arith.constant 0 : index
    %c0_43 = arith.constant 0 : index
    %161 = vector.load %arg13[%c0_42, %c0_43] : memref<8x1xf32, #tpu.memory_space<vmem>>, vector<8x1xf32>
    %cst_44 = arith.constant dense<0.000000e+00> : vector<8xf32>
    %162 = vector.multi_reduction <add>, %159, %cst_44 [1] : vector<8x512xf32> to vector<8xf32>
    %163 = vector.shape_cast %162 : vector<8xf32> to vector<8x1xf32>
    %cst_45 = arith.constant 5.120000e+02 : f32
    %164 = vector.broadcast %cst_45 : f32 to vector<8x1xf32>
    %165 = arith.divf %163, %164 : vector<8x1xf32>
    %166 = vector.broadcast %165 : vector<8x1xf32> to vector<8x512xf32>
    %167 = arith.subf %159, %166 : vector<8x512xf32>
    %168 = arith.mulf %167, %167 : vector<8x512xf32>
    %cst_46 = arith.constant dense<0.000000e+00> : vector<8xf32>
    %169 = vector.multi_reduction <add>, %168, %cst_46 [1] : vector<8x512xf32> to vector<8xf32>
    %170 = vector.shape_cast %169 : vector<8xf32> to vector<8x1xf32>
    %cst_47 = arith.constant 5.120000e+02 : f32
    %171 = vector.broadcast %cst_47 : f32 to vector<8x1xf32>
    %172 = arith.divf %170, %171 : vector<8x1xf32>
    %173 = vector.broadcast %165 : vector<8x1xf32> to vector<8x512xf32>
    %174 = arith.subf %159, %173 : vector<8x512xf32>
    %cst_48 = arith.constant 9.99999974E-6 : f32
    %175 = vector.broadcast %cst_48 : f32 to vector<8x1xf32>
    %176 = arith.addf %172, %175 : vector<8x1xf32>
    %177 = math.rsqrt %176 : vector<8x1xf32>
    %178 = vector.broadcast %177 : vector<8x1xf32> to vector<8x512xf32>
    %179 = arith.mulf %174, %178 : vector<8x512xf32>
    %180 = vector.broadcast %160 : vector<8x1xf32> to vector<8x512xf32>
    %181 = arith.mulf %179, %180 : vector<8x512xf32>
    %182 = vector.broadcast %161 : vector<8x1xf32> to vector<8x512xf32>
    %183 = arith.addf %181, %182 : vector<8x512xf32>
    %184 = arith.addf %158, %183 : vector<8x512xf32>
    %185 = vector.extract_strided_slice %184 {offsets = [0, 0], sizes = [8, 256], strides = [1, 1]} : vector<8x512xf32> to vector<8x256xf32>
    %c0_49 = arith.constant 0 : index
    %c0_50 = arith.constant 0 : index
    %c0_51 = arith.constant 0 : index
    %186 = vector.load %arg14[%c0_49, %c0_50, %c0_51] : memref<2x8x256xf32, #tpu.memory_space<vmem>>, vector<1x8x256xf32>
    %187 = vector.shape_cast %186 : vector<1x8x256xf32> to vector<8x256xf32>
    %188 = vector.shape_cast %185 : vector<8x256xf32> to vector<1x8x256xf32>
    tpu.vector_store %arg14[%c0_49, %c0_50, %c0_51], %188 {strides = array<i32>} : memref<2x8x256xf32, #tpu.memory_space<vmem>>, vector<1x8x256xf32>,
    %189 = vector.extract_strided_slice %184 {offsets = [0, 256], sizes = [8, 256], strides = [1, 1]} : vector<8x512xf32> to vector<8x256xf32>
    %c1 = arith.constant 1 : index
    %c0_52 = arith.constant 0 : index
    %c0_53 = arith.constant 0 : index
    %190 = vector.load %arg14[%c1, %c0_52, %c0_53] : memref<2x8x256xf32, #tpu.memory_space<vmem>>, vector<1x8x256xf32>
    %191 = vector.shape_cast %190 : vector<1x8x256xf32> to vector<8x256xf32>
    %192 = vector.shape_cast %189 : vector<8x256xf32> to vector<1x8x256xf32>
    tpu.vector_store %arg14[%c1, %c0_52, %c0_53], %192 {strides = array<i32>} : memref<2x8x256xf32, #tpu.memory_space<vmem>>, vector<1x8x256xf32>,
    return
  }
  func.func @transform_0(%arg0: i32) -> (i32, i32, i32) {
    %c0_i32 = arith.constant 0 : i32
    %c0_i32_0 = arith.constant 0 : i32
    %c0_i32_1 = arith.constant 0 : i32
    %c0_i32_2 = arith.constant 0 : i32
    return %c0_i32, %c0_i32_0, %c0_i32_1 : i32, i32, i32
  }
  func.func @transform_1(%arg0: i32) -> (i32, i32) {
    %c0_i32 = arith.constant 0 : i32
    %c0_i32_0 = arith.constant 0 : i32
    %c0_i32_1 = arith.constant 0 : i32
    return %c0_i32, %c0_i32_0 : i32, i32
  }
  func.func @transform_2(%arg0: i32) -> (i32, i32) {
    %c0_i32 = arith.constant 0 : i32
    %c0_i32_0 = arith.constant 0 : i32
    %c0_i32_1 = arith.constant 0 : i32
    return %c0_i32, %c0_i32_0 : i32, i32
  }
  func.func @transform_3(%arg0: i32) -> (i32, i32) {
    %c0_i32 = arith.constant 0 : i32
    %c0_i32_0 = arith.constant 0 : i32
    %c0_i32_1 = arith.constant 0 : i32
    return %c0_i32, %c0_i32_0 : i32, i32
  }
  func.func @transform_4(%arg0: i32) -> (i32, i32) {
    %c0_i32 = arith.constant 0 : i32
    %c0_i32_0 = arith.constant 0 : i32
    %c0_i32_1 = arith.constant 0 : i32
    return %c0_i32, %c0_i32_0 : i32, i32
  }
  func.func @transform_5(%arg0: i32) -> (i32, i32) {
    %c0_i32 = arith.constant 0 : i32
    %c0_i32_0 = arith.constant 0 : i32
    %c0_i32_1 = arith.constant 0 : i32
    return %c0_i32, %c0_i32_0 : i32, i32
  }
  func.func @transform_6(%arg0: i32) -> (i32, i32) {
    %c0_i32 = arith.constant 0 : i32
    %c0_i32_0 = arith.constant 0 : i32
    %c0_i32_1 = arith.constant 0 : i32
    return %c0_i32, %c0_i32_0 : i32, i32
  }
  func.func @transform_7(%arg0: i32) -> (i32, i32) {
    %c0_i32 = arith.constant 0 : i32
    %c0_i32_0 = arith.constant 0 : i32
    %c0_i32_1 = arith.constant 0 : i32
    return %c0_i32, %c0_i32_0 : i32, i32
  }
  func.func @transform_8(%arg0: i32) -> (i32, i32) {
    %c0_i32 = arith.constant 0 : i32
    %c0_i32_0 = arith.constant 0 : i32
    %c0_i32_1 = arith.constant 0 : i32
    return %c0_i32, %c0_i32_0 : i32, i32
  }
  func.func @transform_9(%arg0: i32) -> (i32, i32) {
    %c0_i32 = arith.constant 0 : i32
    %c0_i32_0 = arith.constant 0 : i32
    %c0_i32_1 = arith.constant 0 : i32
    return %c0_i32, %c0_i32_0 : i32, i32
  }
  func.func @transform_10(%arg0: i32) -> (i32, i32) {
    %c0_i32 = arith.constant 0 : i32
    %c0_i32_0 = arith.constant 0 : i32
    %c0_i32_1 = arith.constant 0 : i32
    return %c0_i32, %c0_i32_0 : i32, i32
  }
  func.func @transform_11(%arg0: i32) -> (i32, i32) {
    %c0_i32 = arith.constant 0 : i32
    %c0_i32_0 = arith.constant 0 : i32
    %c0_i32_1 = arith.constant 0 : i32
    return %c0_i32, %c0_i32_0 : i32, i32
  }
  func.func @transform_12(%arg0: i32) -> (i32, i32) {
    %c0_i32 = arith.constant 0 : i32
    %c0_i32_0 = arith.constant 0 : i32
    %c0_i32_1 = arith.constant 0 : i32
    return %c0_i32, %c0_i32_0 : i32, i32
  }
  func.func @transform_13(%arg0: i32) -> (i32, i32, i32) {
    %c0_i32 = arith.constant 0 : i32
    %c0_i32_0 = arith.constant 0 : i32
    %c0_i32_1 = arith.constant 0 : i32
    %c0_i32_2 = arith.constant 0 : i32
    return %c0_i32, %c0_i32_0, %c0_i32_1 : i32, i32, i32
  }
}

</mosaic_0001>

<bundles_post_ra>
// kernel: tpu_custom_call.1
= control target key start
LH: loop header
LB: loop body
LE: loop exit
PB: predicated region body
PF: predicated region fallthrough
CT: control target
= control target key end

     0   :  { %vm60_vm0 = vcmask 1043456   ;;  %v1065_v3 = vmov 0.0   ;;  %s1475_s0 = inlined_call_operand.vmem [shape: f32[2,4,256], index: 0, kind: input, shape index: {}]   ;;  %s1476_s1 = inlined_call_operand.vmem [shape: f32[16,4], index: 1, kind: input, shape index: {}]   ;;  %s1477_s2 = inlined_call_operand.vmem [shape: f32[8,9], index: 2, kind: input, shape index: {}]   ;;  %s1478_s3 = inlined_call_operand.vmem [shape: f32[8,8], index: 3, kind: input, shape index: {}]   ;;  %s1479_s4 = inlined_call_operand.vmem [shape: f32[9,512], index: 4, kind: input, shape index: {}]   ;;  %s1480_s5 = inlined_call_operand.vmem [shape: f32[8,1], index: 5, kind: input, shape index: {}]   ;;  %s1481_s6 = inlined_call_operand.vmem [shape: f32[8,1], index: 6, kind: input, shape index: {}]   ;;  %s1482_s7 = inlined_call_operand.vmem [shape: f32[8,1], index: 7, kind: input, shape index: {}]   ;;  %s1483_s8 = inlined_call_operand.vmem [shape: f32[8,1], index: 8, kind: input, shape index: {}]   ;;  %s1484_s9 = inlined_call_operand.vmem [shape: f32[8,1], index: 9, kind: input, shape index: {}]   ;;  %s1485_s10 = inlined_call_operand.vmem [shape: f32[8,1], index: 10, kind: input, shape index: {}]   ;;  %s1486_s11 = inlined_call_operand.vmem [shape: f32[8,1], index: 11, kind: input, shape index: {}]   ;;  %s1487_s12 = inlined_call_operand.vmem [shape: f32[8,1], index: 12, kind: input, shape index: {}]   ;;  %s1488_s13 = inlined_call_operand.hbm [shape: f32[2,8,256], index: 13, kind: output, shape index: {}]  }
   0x1   :  { %v45_v0 = vld [vmem:[%s1475_s0] sm:$0xff]  ;;  %v46_v1 = vld [vmem:[%s1475_s0 + $0x8] sm:$0xff]  ;;  %133 = vmatprep.mubr.f32.mxu0 %v1065_v3  ;;  %210 = vmatprep.mubr.f32.mxu1 %v1065_v3 }
   0x2   :  { %v48_v2 = vcombine.high %v45_v0, %v45_v0  ;;  %v50_v4 = vcombine.high %v46_v1, %v46_v1 }
   0x3   :  { %18 = vsyncpa [#allocation3], 0  ;;  %v51_v5 = vld [vmem:[%s1476_s1] sm:$0xff]  ;;  %vm53_vm1 = vcmask 31744   ;;  %v1066_v14 = vmov 0   ;;  %v1067_v15 = vmov 4   ;;  %v283_v63 = vlaneseq }
   0x4   :  { %988 = vmatprep.subr.msk.mxu0 %vm60_vm0, %v48_v2  ;;  %992 = vmatprep.subr.msk.mxu1 %vm60_vm0, %v50_v4  ;;  %v223_v13 = vld [vmem:[%s1480_s5] sm:$0xff]  ;;  %v1068_v31 = vmov 1   ;;  %v1069_v32 = vmov 2   ;;  %v1070_v33 = vmov 3   ;;  %v1071_v34 = vmov 5   ;;  %s1076_s5 = smov 17  }
   0x5   :  { %989 = vmatpush1.msk.msra.mxu0 %vm60_vm0, %v45_v0  ;;  %993 = vmatpush1.msk.msra.mxu1 %vm60_vm0, %v46_v1  ;;  %v224_v16 = vld [vmem:[%s1481_s6] sm:$0xff]  ;;  %v1072_v35 = vmov 6   ;;  %v1073_v36 = vmov 7   ;;  %v1074_v37 = vmov 8   ;;  %s1077_s6 = smov 1   ;;  %s1078_s19 = smov 127  }
   0x6   :  { %990 = vmatmul.mubr.msk.f32.vlgmr.msra.gmra.mxu0 %vm53_vm1, %v51_v5  ;;  %994 = vmatmul.mubr.msk.f32.vlgmr.msra.gmra.mxu1 %vm53_vm1, %v51_v5  ;;  %v274_v17 = vld [vmem:[%s1477_s2] sm:$0xff]  ;;  %s1075_s2 = smov 15   ;;  %s1079_s20 = smov 16   ;;  %v52_v60 = vld [vmem:[%s1476_s1 + $0x8] sm:$0xff]  ;;  %v1228_v2 = vshrl.u32 %v283_v63, 7  ;;  %vm725_vm10 = vcmask 64512  }
   0x7   :  { %139 = vmatprep.mubr.f32.mxu0 %v1065_v3  ;;  %216 = vmatprep.mubr.f32.mxu1 %v1065_v3  ;;  %s1080_s21 = smov 113   ;;  %s1081_s22 = smov 112  }
   0x8   :  { %1022 = vset.pattern.permute.xlu1 %v1066_v14  ;;  %1023 = vset.pattern.permute.xlu0 %v1067_v15  ;;  %s1082_s23 = smov 111  }
   0x9   :  { %254 = vperm.xlu1 %1022, %v223_v13  }
   0xa   :  { %991 = vmatmul.mubr.msk.f32.gmra.mxu0 %vm53_vm1, %v52_v60  ;;  %995 = vmatmul.mubr.msk.f32.gmra.mxu1 %vm53_vm1, %v52_v60 }
   0xb   :  { %793 = vmatprep.mubr.f32.mxu0 %v1065_v3  ;;  %864 = vmatprep.mubr.f32.mxu1 %v1065_v3  ;;  %v1238_v3 = vld [vmem:[%s1479_s4 + $0x8] sm:$0xff] }
   0xd   :  { %263 = vperm.xlu1 %1022, %v224_v16  }
  0x11   :  { %348 = vperm.xlu1 %1022, %v274_v17  }
  0x15   :  { %1024 = vset.pattern.permute.xlu1 %v1068_v31  ;;  %v1267_v31 = vld [vmem:[%s1479_s4 + $0x10] sm:$0xff] }
  0x16   :  { %393 = vperm.xlu1 %1024, %v274_v17  }
  0x1a   :  { %1025 = vset.pattern.permute.xlu1 %v1069_v32  ;;  %v374_v32 = vsub.s32 1, %v1228_v2 }
  0x1b   :  { %438 = vperm.xlu1 %1025, %v274_v17  }
  0x1f   :  { %1026 = vset.pattern.permute.xlu1 %v1070_v33 }
  0x20   :  { %483 = vperm.xlu1 %1026, %v274_v17  }
  0x24   :  { %1032 = vset.pattern.permute.xlu1 %v1066_v14 }
  0x84   :  { %v255_v41 = vpop.permute.xlu1 %254 }
  0x88   :  { %v264_v50 = vpop.permute.xlu1 %263 }
  0x8c   :  { %v1220_v61 = vpop.permute.xlu1 %348 }
  0x91   :  { %v1222_v62 = vpop.permute.xlu1 %393 }
  0x96   :  { %v1224_v0 = vpop.permute.xlu1 %438 }
  0x9b   :  { %v1232_v5 = vpop.permute.xlu1 %483 }
  0xc6   :  { %v135_v6 = vpop.f32.mrf.mxu0  ;;  %v212_v8 = vpop.f32.mrf.mxu1 }
  0xc8   :  { %v137_v7 = vpop.f32.mrf.mxu0  ;;  %v214_v11 = vpop.f32.mrf.mxu1 }
  0xc9   :  { %v225_v9 = vadd.f32 %v137_v7, %v135_v6 }
  0xcb   :  { %v226_v10 = vadd.f32 %v225_v9, %v212_v8 }
  0xcd   :  { %v227_v12 = vadd.f32 %v226_v10, %v214_v11 }
  0xcf   :  { %228 = vadd.xlane.f32.xlu0 %v227_v12 }
 0x158   :  { %v229_v18 = vpop.xlane.xlu0 %228 }
 0x159   :  { %v231_v19 = vmul.f32 0.001953125, %v229_v18 }
 0x15b   :  { %v232_v20 = vsub.f32 %v135_v6, %v231_v19  ;;  %v233_v21 = vsub.f32 %v137_v7, %v231_v19  ;;  %v234_v22 = vsub.f32 %v212_v8, %v231_v19  ;;  %v235_v23 = vsub.f32 %v214_v11, %v231_v19 }
 0x15c   :  { %v285_v6 = vsub.s32 4, %v1228_v2  ;;  %v1240_v7 = vand.u32 127, %v283_v63  ;;  %v1243_v8 = vsub.s32 0, %v1228_v2 }
 0x15d   :  { %v236_v24 = vmul.f32 %v232_v20, %v232_v20  ;;  %v237_v25 = vmul.f32 %v233_v21, %v233_v21  ;;  %v238_v26 = vmul.f32 %v234_v22, %v234_v22  ;;  %v239_v28 = vmul.f32 %v235_v23, %v235_v23 }
 0x15e   :  { %v290_v9 = vrot.slane %v1238_v3, %v285_v6  ;;  %vm322_vm2 = vcmp.lt.s32.totalorder %v1240_v7, 17  ;;  %v334_v12 = vrot.slane %v1238_v3, %v1243_v8  ;;  %vm367_vm3 = vcmp.lt.s32.totalorder %v1240_v7, 16 }
 0x15f   :  { %v240_v27 = vadd.f32 %v237_v25, %v236_v24  ;;  %vm412_vm4 = vcmp.lt.s32.totalorder %v1240_v7, 15  ;;  %vm457_vm5 = vcmp.lt.s32.totalorder %v1240_v7, 1  ;;  %vm502_vm6 = vcmp.lt.s32.totalorder %v1240_v7, 127 }
 0x160   :  { %vm547_vm7 = vcmp.lt.s32.totalorder %v1240_v7, 113  ;;  %vm592_vm8 = vcmp.lt.s32.totalorder %v1240_v7, 112  ;;  %vm637_vm9 = vcmp.lt.s32.totalorder %v1240_v7, 111 }
 0x161   :  { %v241_v29 = vadd.f32 %v240_v27, %v238_v26 }
 0x163   :  { %v242_v30 = vadd.f32 %v241_v29, %v239_v28  ;;  %v1262_v29 = vld [vmem:[%s1479_s4] sm:$0xff] }
 0x164   :  { %v286_v33 = vrot.slane %v1262_v29, %v285_v6 }
 0x165   :  { %243 = vadd.xlane.f32.xlu0 %v242_v30 }
 0x17b   :  { %305 = vperm.xlu0 %1023, %v274_v17  }
 0x17f   :  { %1027 = vset.pattern.permute.xlu0 %v1071_v34  ;;  %v1274_v34 = vld [vmem:[%s1479_s4 + $0x18] sm:$0xff] }
 0x180   :  { %528 = vperm.xlu0 %1027, %v274_v17  }
 0x184   :  { %1028 = vset.pattern.permute.xlu0 %v1072_v35  ;;  %v294_v35 = vrot.slane %v1267_v31, %v285_v6 }
 0x185   :  { %573 = vperm.xlu0 %1028, %v274_v17  }
 0x189   :  { %1029 = vset.pattern.permute.xlu0 %v1073_v36 }
 0x18a   :  { %618 = vperm.xlu0 %1029, %v274_v17  }
 0x18e   :  { %1030 = vset.pattern.permute.xlu0 %v1074_v37 }
 0x18f   :  { %663 = vperm.xlu0 %1030, %v274_v17  }
 0x193   :  { %1031 = vset.pattern.permute.xlu0 %v1066_v14 }
 0x1ee   :  { %v244_v38 = vpop.xlane.xlu0 %243 }
 0x1ef   :  { %v245_v39 = vmul.f32 0.001953125, %v244_v38  ;;  %v1279_v38 = vsub.s32 2, %v1228_v2 }
 0x1f1   :  { %v246_v40 = vadd.f32 1e-05, %v245_v39  ;;  %v330_v39 = vrot.slane %v1262_v29, %v1243_v8 }
 0x1f3   :  { %1035 = vrsqrt.f32 %v246_v40  ;;  %v379_v40 = vrot.slane %v1238_v3, %v374_v32 }
 0x1f6   :  { %v1226_v1 = vpop.permute.xlu0 %305 }
 0x1fb   :  { %v1230_v4 = vpop.permute.xlu0 %528 }
 0x200   :  { %v1036_v42 = vpop.eup %1035  ;;  %v1246_v10 = vpop.permute.xlu0 %573 }
 0x201   :  { %v248_v43 = vmul.f32 %v1036_v42, %v232_v20  ;;  %v249_v44 = vmul.f32 %v1036_v42, %v233_v21  ;;  %v251_v45 = vmul.f32 %v1036_v42, %v235_v23  ;;  %v250_v46 = vmul.f32 %v1036_v42, %v234_v22 }
 0x203   :  { %v257_v47 = vmul.f32 %v255_v41, %v248_v43  ;;  %v258_v48 = vmul.f32 %v255_v41, %v249_v44  ;;  %v260_v49 = vmul.f32 %v255_v41, %v251_v45  ;;  %v259_v52 = vmul.f32 %v255_v41, %v250_v46 }
 0x204   :  { %v298_v41 = vrot.slane %v1274_v34, %v285_v6  ;;  %v375_v44 = vrot.slane %v1262_v29, %v374_v32  ;;  %v383_v6 = vrot.slane %v1267_v31, %v374_v32 }
 0x205   :  { %v266_v51 = vadd.f32 %v264_v50, %v257_v47  ;;  %v267_v53 = vadd.f32 %v264_v50, %v258_v48  ;;  %v269_v54 = vadd.f32 %v264_v50, %v260_v49  ;;  %v268_v56 = vadd.f32 %v264_v50, %v259_v52  ;;  %v1251_v16 = vpop.permute.xlu0 %618 }
 0x206   :  { %v420_v48 = vrot.slane %v1262_v29, %v1279_v38  ;;  %v432_v50 = vrot.slane %v1274_v34, %v1279_v38  ;;  %v342_v52 = vrot.slane %v1274_v34, %v1243_v8 }
 0x207   :  { %v1179_v55 = vmax.f32 %v266_v51, 0.0  ;;  %v271_v57 = vmax.f32 %v267_v53, 0.0  ;;  %v1183_v58 = vmax.f32 %v269_v54, 0.0  ;;  %v1186_v59 = vmax.f32 %v268_v56, 0.0 }
 0x208   :  { %v424_v54 = vrot.slane %v1238_v3, %v1279_v38 }
 0x209   :  { %404 = vrot.lane.b32.xlu0 %v1179_v55, %s1075_s2  ;;  %312 = vrot.lane.b32.xlu1 %v1179_v55, %s1076_s5  ;;  %v300_v13 = vmul.f32 %v290_v9, %v271_v57  ;;  %v299_v42 = vmul.f32 %v286_v33, %v1179_v55  ;;  %v301_v45 = vmul.f32 %v294_v35, %v1186_v59 }
 0x20a   :  { %v1257_v23 = vpop.permute.xlu0 %663  ;;  %v302_v56 = vmul.f32 %v298_v41, %v1183_v58  ;;  %v387_v9 = vrot.slane %v1274_v34, %v374_v32 }
 0x20b   :  { %v309_v18 = vmul.f32 %v1226_v1, %v300_v13  ;;  %v310_v63 = vmul.f32 %v1226_v1, %v301_v45 }
 0x20d   :  { %410 = vrot.lane.b32.xlu0 %v1183_v58, %s1075_s2  ;;  %314 = vrot.lane.b32.xlu1 %v271_v57, %s1076_s5 }
 0x211   :  { %408 = vrot.lane.b32.xlu0 %v1186_v59, %s1075_s2  ;;  %318 = vrot.lane.b32.xlu1 %v1183_v58, %s1076_s5 }
 0x215   :  { %451 = vrot.lane.b32.xlu0 %v271_v57, %s1077_s6  ;;  %316 = vrot.lane.b32.xlu1 %v1186_v59, %s1076_s5 }
 0x219   :  { %496 = vrot.lane.b32.xlu0 %v271_v57, %s1078_s19  ;;  %359 = vrot.lane.b32.xlu1 %v1179_v55, %s1079_s20 }
 0x21d   :  { %541 = vrot.lane.b32.xlu0 %v271_v57, %s1080_s21  ;;  %361 = vrot.lane.b32.xlu1 %v271_v57, %s1079_s20 }
 0x221   :  { %586 = vrot.lane.b32.xlu0 %v271_v57, %s1081_s22  ;;  %365 = vrot.lane.b32.xlu1 %v1183_v58, %s1079_s20 }
 0x225   :  { %631 = vrot.lane.b32.xlu0 %v271_v57, %s1082_s23  ;;  %363 = vrot.lane.b32.xlu1 %v1186_v59, %s1079_s20 }
 0x229   :  { %635 = vrot.lane.b32.xlu0 %v1183_v58, %s1082_s23  ;;  %406 = vrot.lane.b32.xlu1 %v271_v57, %s1075_s2  ;;  %v308_v57 = vmul.f32 %v1226_v1, %v299_v42 }
 0x22d   :  { %449 = vrot.lane.b32.xlu1 %v1179_v55, %s1077_s6 }
 0x231   :  { %455 = vrot.lane.b32.xlu1 %v1183_v58, %s1077_s6 }
 0x235   :  { %453 = vrot.lane.b32.xlu1 %v1186_v59, %s1077_s6 }
 0x239   :  { %494 = vrot.lane.b32.xlu1 %v1179_v55, %s1078_s19 }
 0x23d   :  { %498 = vrot.lane.b32.xlu1 %v1186_v59, %s1078_s19 }
 0x241   :  { %500 = vrot.lane.b32.xlu1 %v1183_v58, %s1078_s19 }
 0x245   :  { %539 = vrot.lane.b32.xlu1 %v1179_v55, %s1080_s21 }
 0x249   :  { %543 = vrot.lane.b32.xlu1 %v1186_v59, %s1080_s21 }
 0x24d   :  { %545 = vrot.lane.b32.xlu1 %v1183_v58, %s1080_s21 }
 0x251   :  { %584 = vrot.lane.b32.xlu1 %v1179_v55, %s1081_s22 }
 0x255   :  { %588 = vrot.lane.b32.xlu1 %v1186_v59, %s1081_s22 }
 0x259   :  { %590 = vrot.lane.b32.xlu1 %v1183_v58, %s1081_s22 }
 0x25d   :  { %629 = vrot.lane.b32.xlu1 %v1179_v55, %s1082_s23  ;;  %v1302_v55 = vsub.s32 3, %v1228_v2 }
 0x25f   :  { %v465_v35 = vrot.slane %v1262_v29, %v1302_v55 }
 0x261   :  { %633 = vrot.lane.b32.xlu1 %v1186_v59, %s1082_s23  ;;  %v338_v59 = vrot.slane %v1267_v31, %v1243_v8 }
 0x27b   :  { %v313_v11 = vpop.permute.xlu1 %312  ;;  %v405_v28 = vpop.permute.xlu0 %404 }
 0x27f   :  { %v315_v14 = vpop.permute.xlu1 %314  ;;  %v411_v36 = vpop.permute.xlu0 %410 }
 0x280   :  { %v325_v15 = vsel %vm322_vm2, %v313_v11, %v315_v14 }
 0x281   :  { %v344_v17 = vmul.f32 %v334_v12, %v325_v15  ;;  %v416_v12 = vsel %vm412_vm4, %v411_v36, %v405_v28 }
 0x283   :  { %v352_v19 = vmul.f32 %v1220_v61, %v344_v17  ;;  %v319_v20 = vpop.permute.xlu1 %318  ;;  %v409_v51 = vpop.permute.xlu0 %408 }
 0x284   :  { %v326_v21 = vsel %vm322_vm2, %v319_v20, %v313_v11 }
 0x285   :  { %v1255_v22 = vadd.f32 %v352_v19, %v309_v18  ;;  %v343_v49 = vmul.f32 %v330_v39, %v326_v21  ;;  %v469_v18 = vrot.slane %v1238_v3, %v1302_v55 }
 0x287   :  { %v317_v24 = vpop.permute.xlu1 %316  ;;  %v351_v58 = vmul.f32 %v1220_v61, %v343_v49  ;;  %v452_v32 = vpop.permute.xlu0 %451 }
 0x288   :  { %v323_v25 = vsel %vm322_vm2, %v317_v24, %v319_v20  ;;  %v324_v26 = vsel %vm322_vm2, %v315_v14, %v317_v24  ;;  %v428_v24 = vrot.slane %v1267_v31, %v1279_v38 }
 0x289   :  { %v346_v14 = vmul.f32 %v342_v52, %v323_v25  ;;  %v345_v19 = vmul.f32 %v338_v59, %v324_v26  ;;  %v413_v26 = vsel %vm412_vm4, %v409_v51, %v411_v36  ;;  %v473_v36 = vrot.slane %v1267_v31, %v1302_v55 }
 0x28b   :  { %v360_v27 = vpop.permute.xlu1 %359  ;;  %v354_v38 = vmul.f32 %v1220_v61, %v346_v14 }
 0x28f   :  { %v362_v30 = vpop.permute.xlu1 %361 }
 0x290   :  { %v370_v43 = vsel %vm367_vm3, %v360_v27, %v362_v30 }
 0x291   :  { %v389_v53 = vmul.f32 %v379_v40, %v370_v43  ;;  %v311_v43 = vmul.f32 %v1226_v1, %v302_v56 }
 0x293   :  { %v366_v37 = vpop.permute.xlu1 %365  ;;  %v397_v15 = vmul.f32 %v1222_v62, %v389_v53  ;;  %v358_v1 = vadd.f32 %v354_v38, %v311_v43 }
 0x294   :  { %v371_v46 = vsel %vm367_vm3, %v366_v37, %v360_v27  ;;  %v433_v27 = vmul.f32 %v420_v48, %v416_v12 }
 0x295   :  { %v388_v60 = vmul.f32 %v375_v44, %v371_v46  ;;  %v401_v40 = vadd.f32 %v397_v15, %v1255_v22  ;;  %v353_v44 = vmul.f32 %v1220_v61, %v345_v19  ;;  %v436_v22 = vmul.f32 %v432_v50, %v413_v26 }
 0x296   :  { %v441_v52 = vmul.f32 %v1224_v0, %v433_v27  ;;  %v477_v61 = vrot.slane %v1274_v34, %v1302_v55 }
 0x297   :  { %v364_v47 = vpop.permute.xlu1 %363  ;;  %v396_v20 = vmul.f32 %v1222_v62, %v388_v60  ;;  %v357_v59 = vadd.f32 %v353_v44, %v310_v63  ;;  %v444_v12 = vmul.f32 %v1224_v0, %v436_v22 }
 0x298   :  { %v368_v13 = vsel %vm367_vm3, %v364_v47, %v366_v37  ;;  %v369_v21 = vsel %vm367_vm3, %v362_v30, %v364_v47  ;;  %v355_v37 = vadd.f32 %v351_v58, %v308_v57 }
 0x299   :  { %v391_v33 = vmul.f32 %v387_v9, %v368_v13  ;;  %v390_v41 = vmul.f32 %v383_v6, %v369_v21 }
 0x29a   :  { %v400_v45 = vadd.f32 %v396_v20, %v355_v37  ;;  %v554_v37 = vsub.s32 6, %v1228_v2 }
 0x29b   :  { %v407_v11 = vpop.permute.xlu1 %406  ;;  %v399_v46 = vmul.f32 %v1222_v62, %v391_v33 }
 0x29c   :  { %v415_v8 = vsel %vm412_vm4, %v405_v28, %v407_v11  ;;  %v414_v39 = vsel %vm412_vm4, %v407_v11, %v409_v51  ;;  %v445_v9 = vadd.f32 %v441_v52, %v400_v45  ;;  %v555_v44 = vrot.slane %v1262_v29, %v554_v37 }
 0x29d   :  { %v434_v17 = vmul.f32 %v424_v54, %v415_v8  ;;  %v435_v47 = vmul.f32 %v428_v24, %v414_v39  ;;  %v398_v54 = vmul.f32 %v1222_v62, %v390_v41  ;;  %v403_v60 = vadd.f32 %v399_v46, %v358_v1 }
 0x29e   :  { %v559_v45 = vrot.slane %v1238_v3, %v554_v37  ;;  %v567_v52 = vrot.slane %v1274_v34, %v554_v37 }
 0x29f   :  { %v442_v25 = vmul.f32 %v1224_v0, %v434_v17  ;;  %v450_v28 = vpop.permute.xlu1 %449  ;;  %v443_v6 = vmul.f32 %v1224_v0, %v435_v47  ;;  %v402_v62 = vadd.f32 %v398_v54, %v357_v59  ;;  %v448_v15 = vadd.f32 %v444_v12, %v403_v60 }
 0x2a0   :  { %v460_v30 = vsel %vm457_vm5, %v450_v28, %v452_v32 }
 0x2a1   :  { %v479_v42 = vmul.f32 %v469_v18, %v460_v30  ;;  %v446_v48 = vadd.f32 %v442_v25, %v401_v40  ;;  %v447_v14 = vadd.f32 %v443_v6, %v402_v62 }
 0x2a3   :  { %v487_v49 = vmul.f32 %v1232_v5, %v479_v42  ;;  %v456_v51 = vpop.permute.xlu1 %455  ;;  %v599_v42 = vsub.s32 7, %v1228_v2 }
 0x2a4   :  { %v461_v53 = vsel %vm457_vm5, %v456_v51, %v450_v28 }
 0x2a5   :  { %v1350_v56 = vadd.f32 %v487_v49, %v446_v48  ;;  %v478_v57 = vmul.f32 %v465_v35, %v461_v53  ;;  %v509_v35 = vsub.s32 5, %v1228_v2  ;;  %v604_v1 = vrot.slane %v1238_v3, %v599_v42 }
 0x2a6   :  { %v608_v12 = vrot.slane %v1267_v31, %v599_v42 }
 0x2a7   :  { %v486_v11 = vmul.f32 %v1232_v5, %v478_v57  ;;  %v454_v50 = vpop.permute.xlu1 %453  ;;  %v514_v38 = vrot.slane %v1238_v3, %v509_v35  ;;  %v518_v41 = vrot.slane %v1267_v31, %v509_v35  ;;  %v522_v2 = vrot.slane %v1274_v34, %v509_v35 }
 0x2a8   :  { %v458_v58 = vsel %vm457_vm5, %v454_v50, %v456_v51  ;;  %v459_v55 = vsel %vm457_vm5, %v452_v32, %v454_v50  ;;  %v497_v32 = vpop.permute.xlu0 %496  ;;  %v563_v51 = vrot.slane %v1267_v31, %v554_v37 }
 0x2a9   :  { %v1359_v13 = vadd.f32 %v486_v11, %v445_v9  ;;  %v480_v8 = vmul.f32 %v473_v36, %v459_v55  ;;  %v481_v63 = vmul.f32 %v477_v61, %v458_v58  ;;  %v600_v61 = vrot.slane %v1262_v29, %v599_v42 }
 0x2ab   :  { %v488_v17 = vmul.f32 %v1232_v5, %v480_v8  ;;  %v489_v18 = vmul.f32 %v1232_v5, %v481_v63  ;;  %v495_v19 = vpop.permute.xlu1 %494  ;;  %v510_v5 = vrot.slane %v1262_v29, %v509_v35 }
 0x2ac   :  { %v542_v25 = vpop.permute.xlu0 %541  ;;  %v505_v30 = vsel %vm502_vm6, %v495_v19, %v497_v32 }
 0x2ad   :  { %v1363_v20 = vadd.f32 %v488_v17, %v447_v14  ;;  %v1365_v0 = vadd.f32 %v489_v18, %v448_v15  ;;  %v523_v46 = vmul.f32 %v510_v5, %v505_v30  ;;  %v996_v14 = vld [vmem:[%s1479_s4 + $0x20] ss:$0 sm:$0xff]  ;;  %v612_v18 = vrot.slane %v1274_v34, %v599_v42 }
 0x2af   :  { %v499_v21 = vpop.permute.xlu1 %498  ;;  %v531_v11 = vmul.f32 %v1230_v4, %v523_v46 }
 0x2b0   :  { %v587_v39 = vpop.permute.xlu0 %586  ;;  %v504_v40 = vsel %vm502_vm6, %v497_v32, %v499_v21 }
 0x2b1   :  { %v524_v49 = vmul.f32 %v514_v38, %v504_v40 }
 0x2b3   :  { %v501_v24 = vpop.permute.xlu1 %500  ;;  %v532_v3 = vmul.f32 %v1230_v4, %v524_v49 }
 0x2b4   :  { %v503_v43 = vsel %vm502_vm6, %v499_v21, %v501_v24  ;;  %v506_v22 = vsel %vm502_vm6, %v501_v24, %v495_v19  ;;  %v632_v54 = vpop.permute.xlu0 %631 }
 0x2b5   :  { %v525_v53 = vmul.f32 %v518_v41, %v503_v43  ;;  %v526_v29 = vmul.f32 %v522_v2, %v506_v22 }
 0x2b7   :  { %v540_v27 = vpop.permute.xlu1 %539  ;;  %v533_v62 = vmul.f32 %v1230_v4, %v525_v53  ;;  %v534_v35 = vmul.f32 %v1230_v4, %v526_v29  ;;  %v998_v4 = vld [vmem:[%s1479_s4 + $0x30] ss:$0 sm:$0xff] }
 0x2b8   :  { %v550_v47 = vsel %vm547_vm7, %v540_v27, %v542_v25 }
 0x2b9   :  { %v568_v57 = vmul.f32 %v555_v44, %v550_v47  ;;  %v537_v5 = vadd.f32 %v533_v62, %v1363_v20  ;;  %v538_v49 = vadd.f32 %v534_v35, %v1365_v0 }
 0x2bb   :  { %v544_v33 = vpop.permute.xlu1 %543  ;;  %v576_v31 = vmul.f32 %v1246_v10, %v568_v57 }
 0x2bc   :  { %v549_v48 = vsel %vm547_vm7, %v542_v25, %v544_v33  ;;  %v535_v25 = vadd.f32 %v531_v11, %v1359_v13 }
 0x2bd   :  { %v569_v59 = vmul.f32 %v559_v45, %v549_v48 }
 0x2be   :  { %v580_v13 = vadd.f32 %v576_v31, %v535_v25  ;;  %v917_v25 = vld [vmem:[%s1486_s11] sm:$0xff] }
 0x2bf   :  { %v546_v28 = vpop.permute.xlu1 %545  ;;  %v577_v15 = vmul.f32 %v1246_v10, %v569_v59 }
 0x2c0   :  { %v548_v60 = vsel %vm547_vm7, %v544_v33, %v546_v28  ;;  %v551_v58 = vsel %vm547_vm7, %v546_v28, %v540_v27  ;;  %v636_v33 = vpop.permute.xlu0 %635  ;;  %v536_v28 = vadd.f32 %v532_v3, %v1350_v56  ;;  %v997_v56 = vld [vmem:[%s1479_s4 + $0x28] ss:$0 sm:$0xff] }
 0x2c1   :  { %v570_v8 = vmul.f32 %v563_v51, %v548_v60  ;;  %v571_v21 = vmul.f32 %v567_v52, %v551_v58 }
 0x2c2   :  { %v581_v20 = vadd.f32 %v577_v15, %v536_v28 }
 0x2c3   :  { %v585_v26 = vpop.permute.xlu1 %584  ;;  %v578_v34 = vmul.f32 %v1246_v10, %v570_v8  ;;  %v579_v42 = vmul.f32 %v1246_v10, %v571_v21 }
 0x2c4   :  { %v595_v6 = vsel %vm592_vm8, %v585_v26, %v587_v39 }
 0x2c5   :  { %v613_v63 = vmul.f32 %v600_v61, %v595_v6  ;;  %v582_v2 = vadd.f32 %v578_v34, %v537_v5  ;;  %v583_v61 = vadd.f32 %v579_v42, %v538_v49 }
 0x2c7   :  { %v589_v36 = vpop.permute.xlu1 %588 }
 0x2c8   :  { %v594_v50 = vsel %vm592_vm8, %v587_v39, %v589_v36  ;;  %v621_v39 = vmul.f32 %v1251_v16, %v613_v63 }
 0x2c9   :  { %v614_v17 = vmul.f32 %v604_v1, %v594_v50 }
 0x2ca   :  { %v625_v51 = vadd.f32 %v621_v39, %v580_v13 }
 0x2cb   :  { %v591_v9 = vpop.permute.xlu1 %590  ;;  %v622_v38 = vmul.f32 %v1251_v16, %v614_v17  ;;  %v674_v17 = vld [vmem:[%s1482_s7] sm:$0xff] }
 0x2cc   :  { %v593_v55 = vsel %vm592_vm8, %v589_v36, %v591_v9  ;;  %v596_v24 = vsel %vm592_vm8, %v591_v9, %v585_v26  ;;  %v999_v26 = vld [vmem:[%s1479_s4 + $0x38] ss:$0 sm:$0xff] }
 0x2cd   :  { %v615_v27 = vmul.f32 %v608_v12, %v593_v55  ;;  %v616_v40 = vmul.f32 %v612_v18, %v596_v24  ;;  %v626_v52 = vadd.f32 %v622_v38, %v581_v20  ;;  %v141_v18 = vpop.f32.mrf.mxu0  ;;  %v218_v24 = vpop.f32.mrf.mxu1 }
 0x2cf   :  { %v630_v19 = vpop.permute.xlu1 %629  ;;  %v623_v43 = vmul.f32 %v1251_v16, %v615_v27  ;;  %v624_v10 = vmul.f32 %v1251_v16, %v616_v40  ;;  %v675_v16 = vld [vmem:[%s1483_s8] sm:$0xff] }
 0x2d0   :  { %v640_v32 = vsel %vm637_vm9, %v630_v19, %v632_v54  ;;  %v641_v30 = vsel %vm637_vm9, %v636_v33, %v630_v19  ;;  %v143_v19 = vpop.f32.mrf.mxu0 }
 0x2d1   :  { %v658_v37 = vmul.f32 %v996_v14, %v640_v32  ;;  %v661_v36 = vmul.f32 %v999_v26, %v641_v30  ;;  %v627_v1 = vadd.f32 %v623_v43, %v582_v2  ;;  %v628_v59 = vadd.f32 %v624_v10, %v583_v61  ;;  %v220_v32 = vpop.f32.mrf.mxu1 }
 0x2d2   :  { %v919_v21 = vadd.f32 %v143_v19, %v141_v18 }
 0x2d3   :  { %v634_v41 = vpop.permute.xlu1 %633  ;;  %v666_v46 = vmul.f32 %v1257_v23, %v658_v37  ;;  %v669_v7 = vmul.f32 %v1257_v23, %v661_v36 }
 0x2d4   :  { %v638_v44 = vsel %vm637_vm9, %v634_v41, %v636_v33  ;;  %v639_v45 = vsel %vm637_vm9, %v632_v54, %v634_v41  ;;  %v920_v27 = vadd.f32 %v919_v21, %v218_v24  ;;  %v918_v21 = vld [vmem:[%s1487_s12] sm:$0xff] }
 0x2d5   :  { %v659_v47 = vmul.f32 %v997_v56, %v639_v45  ;;  %v660_v48 = vmul.f32 %v998_v4, %v638_v44  ;;  %v670_v54 = vadd.f32 %v666_v46, %v625_v51  ;;  %v673_v9 = vadd.f32 %v669_v7, %v628_v59 }
 0x2d6   :  { %v921_v33 = vadd.f32 %v920_v27, %v220_v32 }
 0x2d7   :  { %v667_v22 = vmul.f32 %v1257_v23, %v659_v47  ;;  %v668_v53 = vmul.f32 %v1257_v23, %v660_v48  ;;  %v724_v48 = vld [vmem:[%s1478_s3] sm:$0xff] }
 0x2d9   :  { %v671_v57 = vadd.f32 %v667_v22, %v626_v52  ;;  %v672_v60 = vadd.f32 %v668_v53, %v627_v1 }
 0x2db   :  { %v676_v6 = vadd.f32 %v671_v57, %v670_v54 }
 0x2dd   :  { %v677_v0 = vadd.f32 %v676_v6, %v672_v60 }
 0x2df   :  { %v678_v11 = vadd.f32 %v677_v0, %v673_v9 }
 0x2e1   :  { %679 = vadd.xlane.f32.xlu1 %v678_v11 }
 0x2f2   :  { %713 = vperm.xlu1 %1032, %v675_v16  }
 0x36a   :  { %v680_v50 = vpop.xlane.xlu1 %679 }
 0x36b   :  { %v681_v12 = vmul.f32 0.001953125, %v680_v50 }
 0x36d   :  { %v682_v3 = vsub.f32 %v670_v54, %v681_v12  ;;  %v683_v29 = vsub.f32 %v671_v57, %v681_v12  ;;  %v684_v58 = vsub.f32 %v672_v60, %v681_v12  ;;  %v685_v23 = vsub.f32 %v673_v9, %v681_v12  ;;  %v871_v12 = vld [vmem:[%s1484_s9] sm:$0xff] }
 0x36e   :  { %v714_v4 = vpop.permute.xlu1 %713 }
 0x36f   :  { %v686_v55 = vmul.f32 %v682_v3, %v682_v3  ;;  %v687_v62 = vmul.f32 %v683_v29, %v683_v29  ;;  %v688_v8 = vmul.f32 %v684_v58, %v684_v58  ;;  %v689_v14 = vmul.f32 %v685_v23, %v685_v23 }
 0x371   :  { %v690_v63 = vadd.f32 %v687_v62, %v686_v55 }
 0x373   :  { %v691_v31 = vadd.f32 %v690_v63, %v688_v8 }
 0x375   :  { %v692_v15 = vadd.f32 %v691_v31, %v689_v14 }
 0x377   :  { %693 = vadd.xlane.f32.xlu0 %v692_v15 }
 0x38d   :  { %704 = vperm.xlu0 %1031, %v674_v17  }
 0x3ac   :  { %922 = vadd.xlane.f32.xlu0 %v921_v33 }
 0x3c2   :  { %947 = vperm.xlu0 %1031, %v917_v25  }
 0x400   :  { %v694_v28 = vpop.xlane.xlu0 %693 }
 0x401   :  { %v695_v35 = vmul.f32 0.001953125, %v694_v28 }
 0x403   :  { %v696_v37 = vadd.f32 1e-05, %v695_v35 }
 0x405   :  { %1037 = vrsqrt.f32 %v696_v37 }
 0x408   :  { %v705_v34 = vpop.permute.xlu0 %704 }
 0x412   :  { %v1038_v5 = vpop.eup %1037 }
 0x413   :  { %v698_v39 = vmul.f32 %v1038_v5, %v682_v3  ;;  %v699_v26 = vmul.f32 %v1038_v5, %v683_v29  ;;  %v700_v30 = vmul.f32 %v1038_v5, %v684_v58  ;;  %v701_v56 = vmul.f32 %v1038_v5, %v685_v23  ;;  %v872_v3 = vld [vmem:[%s1485_s10] sm:$0xff]  ;;  %s1083_s10 = smov [#allocation2]  }
 0x414   :  { %s977_s12 = sshll.u32 %s1083_s10, 4  ;;  %s978_s12 = int_to_ptr.vmem [resolvable:$true] %s977_s12 }
 0x415   :  { %v707_v13 = vmul.f32 %v705_v34, %v698_v39  ;;  %v708_v20 = vmul.f32 %v705_v34, %v699_v26  ;;  %v709_v38 = vmul.f32 %v705_v34, %v700_v30  ;;  %v710_v40 = vmul.f32 %v705_v34, %v701_v56  ;;  %s1043_s28 = scalar_lea.vmem %s978_s12, 512  ;;  %p1048_p1 = scmp.lt.s32.totalorder %s978_s12, %s978_s12 }
 0x416   :  { %p1044_p0 = scmp.ne.s32.totalorder %s978_s12, %s1043_s28  ;;  %p1049_p2 = scmp.lt.s32.totalorder %s1043_s28, %s1043_s28 }
 0x417   :  { %v716_v41 = vadd.f32 %v714_v4, %v707_v13  ;;  %v718_v42 = vadd.f32 %v714_v4, %v709_v38  ;;  %v717_v43 = vadd.f32 %v714_v4, %v708_v20  ;;  %v719_v44 = vadd.f32 %v714_v4, %v710_v40 }
 0x418   :  { %p1050_p3 = por %p1049_p2, %p1048_p1 }
 0x419   :  { %v720_v45 = vmax.f32 %v716_v41, 0.0  ;;  %v722_v36 = vmax.f32 %v718_v42, 0.0  ;;  %v721_v46 = vmax.f32 %v717_v43, 0.0  ;;  %v723_v47 = vmax.f32 %v719_v44, 0.0 }
 0x41a   :  { %p1051_p4 = pnand %p1050_p3, %p1044_p0 }
 0x41b   :  { %759 = vmatprep.subr.mxu0 %v721_v46  ;;  %830 = vmatprep.subr.mxu1 %v723_v47 }
 0x41c   :  { %760 = vmatpush1.msra.mxu0 %v720_v45  ;;  %831 = vmatpush1.msra.mxu1 %v722_v36 }
 0x41d   :  { %1000 = vmatmul.mubr.msk.f32.vlgmr.msra.gmra.mxu0 %vm725_vm10, %v724_v48  ;;  %1001 = vmatmul.mubr.msk.f32.vlgmr.msra.gmra.mxu1 %vm725_vm10, %v724_v48 }
 0x435   :  { %v923_v49 = vpop.xlane.xlu0 %922 }
 0x436   :  { %v924_v2 = vmul.f32 0.001953125, %v923_v49 }
 0x438   :  { %v925_v51 = vsub.f32 %v141_v18, %v924_v2  ;;  %v926_v52 = vsub.f32 %v143_v19, %v924_v2  ;;  %v927_v10 = vsub.f32 %v218_v24, %v924_v2  ;;  %v928_v57 = vsub.f32 %v220_v32, %v924_v2 }
 0x43a   :  { %v929_v22 = vmul.f32 %v925_v51, %v925_v51  ;;  %v930_v53 = vmul.f32 %v926_v52, %v926_v52  ;;  %v931_v59 = vmul.f32 %v927_v10, %v927_v10  ;;  %v932_v11 = vmul.f32 %v928_v57, %v928_v57 }
 0x43c   :  { %v933_v60 = vadd.f32 %v930_v53, %v929_v22 }
 0x43d   :  { %v948_v4 = vpop.permute.xlu0 %947 }
 0x43e   :  { %v934_v16 = vadd.f32 %v933_v60, %v931_v59 }
 0x440   :  { %v935_v50 = vadd.f32 %v934_v16, %v932_v11 }
 0x4dd   :  { %v795_v61 = vpop.f32.mrf.mxu0  ;;  %v866_v7 = vpop.f32.mrf.mxu1 }
 0x4df   :  { %v797_v1 = vpop.f32.mrf.mxu0  ;;  %v868_v9 = vpop.f32.mrf.mxu1 }
 0x4e0   :  { %v873_v54 = vadd.f32 %v797_v1, %v795_v61 }
 0x4e2   :  { %v874_v6 = vadd.f32 %v873_v54, %v866_v7 }
 0x4e4   :  { %v875_v0 = vadd.f32 %v874_v6, %v868_v9 }
 0x4e6   :  { %876 = vadd.xlane.f32.xlu1 %v875_v0 }
 0x4ea   :  { %936 = vadd.xlane.f32.xlu1 %v935_v50 }
 0x4fb   :  { %901 = vperm.xlu1 %1032, %v871_v12  }
 0x4ff   :  { %910 = vperm.xlu1 %1032, %v872_v3  }
 0x56f   :  { %v877_v29 = vpop.xlane.xlu1 %876 }
 0x570   :  { %v878_v58 = vmul.f32 0.001953125, %v877_v29 }
 0x572   :  { %v879_v23 = vsub.f32 %v795_v61, %v878_v58  ;;  %v880_v55 = vsub.f32 %v797_v1, %v878_v58  ;;  %v881_v62 = vsub.f32 %v866_v7, %v878_v58  ;;  %v882_v8 = vsub.f32 %v868_v9, %v878_v58 }
 0x573   :  { %v937_v24 = vpop.xlane.xlu1 %936 }
 0x574   :  { %v883_v63 = vmul.f32 %v879_v23, %v879_v23  ;;  %v884_v14 = vmul.f32 %v880_v55, %v880_v55  ;;  %v885_v31 = vmul.f32 %v881_v62, %v881_v62  ;;  %v886_v17 = vmul.f32 %v882_v8, %v882_v8 }
 0x575   :  { %v938_v32 = vmul.f32 0.001953125, %v937_v24 }
 0x576   :  { %v887_v15 = vadd.f32 %v884_v14, %v883_v63 }
 0x577   :  { %v902_v27 = vpop.permute.xlu1 %901  ;;  %v939_v33 = vadd.f32 1e-05, %v938_v32 }
 0x578   :  { %v888_v18 = vadd.f32 %v887_v15, %v885_v31 }
 0x579   :  { %1039 = vrsqrt.f32 %v939_v33 }
 0x57a   :  { %v889_v19 = vadd.f32 %v888_v18, %v886_v17 }
 0x57b   :  { %v911_v25 = vpop.permute.xlu1 %910 }
 0x57c   :  { %890 = vadd.xlane.f32.xlu1 %v889_v19 }
 0x586   :  { %v1040_v5 = vpop.eup %1039 }
 0x587   :  { %v941_v34 = vmul.f32 %v1040_v5, %v925_v51  ;;  %v942_v39 = vmul.f32 %v1040_v5, %v926_v52  ;;  %v943_v26 = vmul.f32 %v1040_v5, %v927_v10  ;;  %v944_v30 = vmul.f32 %v1040_v5, %v928_v57 }
 0x589   :  { %v950_v42 = vmul.f32 %v948_v4, %v941_v34  ;;  %v951_v43 = vmul.f32 %v948_v4, %v942_v39  ;;  %v952_v44 = vmul.f32 %v948_v4, %v943_v26  ;;  %v953_v45 = vmul.f32 %v948_v4, %v944_v30 }
 0x58d   :  { %956 = vperm.xlu1 %1032, %v918_v21  }
 0x605   :  { %v891_v28 = vpop.xlane.xlu1 %890 }
 0x606   :  { %v892_v35 = vmul.f32 0.001953125, %v891_v28 }
 0x608   :  { %v893_v37 = vadd.f32 1e-05, %v892_v35 }
 0x609   :  { %v957_v41 = vpop.permute.xlu1 %956 }
 0x60a   :  { %1041 = vrsqrt.f32 %v893_v37  ;;  %v959_v49 = vadd.f32 %v957_v41, %v950_v42  ;;  %v960_v2 = vadd.f32 %v957_v41, %v951_v43  ;;  %v961_v51 = vadd.f32 %v957_v41, %v952_v44 }
 0x60b   :  { %v962_v52 = vadd.f32 %v957_v41, %v953_v45 }
 0x617   :  { %v1042_v56 = vpop.eup %1041 }
 0x618   :  { %v895_v13 = vmul.f32 %v1042_v56, %v879_v23  ;;  %v896_v20 = vmul.f32 %v1042_v56, %v880_v55  ;;  %v897_v38 = vmul.f32 %v1042_v56, %v881_v62  ;;  %v898_v40 = vmul.f32 %v1042_v56, %v882_v8 }
 0x61a   :  { %v904_v36 = vmul.f32 %v902_v27, %v895_v13  ;;  %v905_v46 = vmul.f32 %v902_v27, %v896_v20  ;;  %v906_v47 = vmul.f32 %v902_v27, %v897_v38  ;;  %v907_v48 = vmul.f32 %v902_v27, %v898_v40 }
 0x61c   :  { %v913_v10 = vadd.f32 %v911_v25, %v904_v36  ;;  %v914_v22 = vadd.f32 %v911_v25, %v905_v46  ;;  %v915_v53 = vadd.f32 %v911_v25, %v906_v47  ;;  %v916_v61 = vadd.f32 %v911_v25, %v907_v48 }
 0x61e   :  { %v963_v1 = vadd.f32 %v959_v49, %v913_v10  ;;  %v964_v7 = vadd.f32 %v960_v2, %v914_v22  ;;  %v965_v54 = vadd.f32 %v961_v51, %v915_v53  ;;  %v966_v57 = vadd.f32 %v962_v52, %v916_v61 }
 0x620   :  { %967 = vst [vmem:[#allocation2] sm:$0xff] %v963_v1  ;;  %968 = vst [vmem:[#allocation2 + $0x8] sm:$0xff] %v964_v7 }
 0x621   :  { %970 = vst [vmem:[#allocation2 + $0x10] sm:$0xff] %v965_v54  ;;  %971 = vst [vmem:[#allocation2 + $0x18] sm:$0xff] %v966_v57 }
 0x622   :  { %1054 = shalt.err (!%p1051_p4)
}
 0x623   :  { %s1084_s29 = smov 256  }
 0x624   :  { %983 = dma.vmem_to_hbm [thread:$0]  %s978_s12, 512, %s1488_s13, [#allocation3], %s1084_s29, %s1084_s29, %s1079_s20  }
 0x625   :  { %1063 = dma.done.wait [#allocation3], 512  }
 0x626   :  { %1064 = vsyncadd [#allocation3], 4294966784 }
 0x627   :  { %987 = vsyncpa [#allocation3], 1 }

</bundles_post_ra>
